<compile_context>
chip_gen: v7x
topology: tpu7x:2x2x1
jax: 0.10.0
libtpu: 0.0.40
codegen_flags: <defaults>
</compile_context>

<pallas_src>
import functools

import jax
import jax.numpy as jnp
from jax.experimental import pallas as pl
from jax.experimental.pallas import tpu as pltpu


def _critic_mlp_kernel(x_ref, w1_ref, b1_ref, w2_ref, b2_ref, w3_ref, b3_ref, o_ref):
    # Layer 1: (tile, S) @ (S, 256) on the MXU, f32 accumulation.
    x = x_ref[...]
    h1 = jnp.dot(x, w1_ref[...], preferred_element_type=jnp.float32) + b1_ref[...]
    h1 = jnp.maximum(h1, 0.0)
    # Layer 2: (tile, 256) @ (256, 128) on the MXU.
    h2 = jnp.dot(h1, w2_ref[...], preferred_element_type=jnp.float32) + b2_ref[...]
    h2 = jnp.maximum(h2, 0.0)
    # Layer 3 (out_features = 1): lane reduction on VPU/XLU instead of a
    # wasteful N=1 MXU matmul.  w3_ref is the (1, 128) PyTorch weight row.
    out = jnp.sum(h2 * w3_ref[...], axis=-1, keepdims=True) + b3_ref[0]
    o_ref[...] = out.astype(o_ref.dtype)


_MAX_BATCH_TILE = 512  # multiple of 256; keeps >=2 grid steps when B > 512 (v7x megacore)


def _pick_batch_tile(B):
    if B <= _MAX_BATCH_TILE:
        # Single grid step: block equal to the full batch dim is always legal,
        # even when B is not a multiple of 8, and removes all pipelining overhead.
        return B
    # Large B: 512-row tiles (multiple of 8) -> ragged last tile is handled by
    # Pallas block padding / masked writes.
    return _MAX_BATCH_TILE


@jax.jit
def actor_critic_forward(state, params):
    """Pallas implementation of ActorCritic.forward (the critic head).

    state:  (B, state_dim) float32
    params: dict with w1 (S,256), b1 (1,256), w2 (256,128), b2 (1,128),
            w3 (1,128)  [PyTorch (out,in) row],  b3 (1,)
    returns (B, 1) float32, matching self.critic(state) in PyTorch.
    """
    B, S = state.shape
    w1, b1 = params["w1"], params["b1"]
    w2, b2 = params["w2"], params["b2"]
    w3, b3 = params["w3"], params["b3"]
    H1, H2 = w1.shape[1], w2.shape[1]
    OUT = 1

    batch_tile = _pick_batch_tile(B)
    grid = (pl.cdiv(B, batch_tile),)

    return pl.pallas_call(
        _critic_mlp_kernel,
        out_shape=jax.ShapeDtypeStruct((B, OUT), jnp.float32),
        grid_spec=pltpu.PrefetchScalarGridSpec(
            num_scalar_prefetch=0,
            grid=grid,
            in_specs=[
                # batch-tiled activations
                pl.BlockSpec((batch_tile, S), lambda i: (i, 0)),
                # weights / biases: same full block for every grid step (stay resident)
                pl.BlockSpec((S, H1), lambda i: (0, 0)),
                pl.BlockSpec((1, H1), lambda i: (0, 0)),
                pl.BlockSpec((H1, H2), lambda i: (0, 0)),
                pl.BlockSpec((1, H2), lambda i: (0, 0)),
                pl.BlockSpec((1, H2), lambda i: (0, 0)),      # w3 row
                # b3: single scalar, lives in SMEM (no padded VMEM tile)
                pl.BlockSpec(memory_space=pltpu.MemorySpace.SMEM),
            ],
            out_specs=pl.BlockSpec((batch_tile, OUT), lambda i: (i, 0)),
        ),
        compiler_params=pltpu.CompilerParams(
            dimension_semantics=("parallel",),
        ),
    )(state, w1, b1, w2, b2, w3, b3)


def init_params(key, state_dim, action_dim):
    """Deterministic synthetic parameters (PyTorch-Linear-like uniform init)."""

    def linear(k, fan_in, fan_out):
        kw, kb = jax.random.split(k)
        bound = 1.0 / jnp.sqrt(jnp.float32(fan_in))
        # stored as (in, out) == W_pt.T
        w = jax.random.uniform(kw, (fan_in, fan_out), jnp.float32, -bound, bound)
        b = jax.random.uniform(kb, (1, fan_out), jnp.float32, -bound, bound)
        return w, b

    k1, k2, k3 = jax.random.split(key, 3)
    w1, b1 = linear(k1, state_dim, 256)
    w2, b2 = linear(k2, 256, 128)
    # Final layer kept in PyTorch (out, in) = (1, 128) layout: it is consumed
    # as a lane row by the in-kernel reduction.  b3 is a plain (1,) scalar.
    kw, kb = jax.random.split(k3)
    bound = 1.0 / jnp.sqrt(jnp.float32(128))
    w3 = jax.random.uniform(kw, (1, 128), jnp.float32, -bound, bound)
    b3 = jax.random.uniform(kb, (1,), jnp.float32, -bound, bound)
    # TODO(synk): actor head + log_std / Normal sampling (act()) are not part of
    # forward(); only the critic hot path is implemented as the Pallas kernel.
    return {"w1": w1, "b1": b1, "w2": w2, "b2": b2, "w3": w3, "b3": b3}


def _reference_forward(state, p):
    h1 = jnp.maximum(state @ p["w1"] + p["b1"], 0.0)
    h2 = jnp.maximum(h1 @ p["w2"] + p["b2"], 0.0)
    return h2 @ p["w3"].T + p["b3"][None, :]


if __name__ == "__main__":
    key = jax.random.PRNGKey(0)
    k_param, k_state1, k_state2 = jax.random.split(key, 3)

    state_dim = 16   # small synthetic observation dim
    action_dim = 4   # only affects actor/log_std, unused by forward()

    params = init_params(k_param, state_dim, action_dim)

    # RL-style small batch: whole forward runs in a single grid step.
    state = jax.random.normal(k_state1, (64, state_dim), jnp.float32)
    value = jax.block_until_ready(actor_critic_forward(state, params))
    ref = _reference_forward(state, params)
    assert value.shape == (64, 1)
    assert jnp.allclose(value, ref, atol=1e-5, rtol=1e-5), "mismatch vs reference (B=64)"

    # Ragged batch (not a multiple of 8) to exercise full-dim block handling.
    state2 = jax.random.normal(k_state2, (37, state_dim), jnp.float32)
    value2 = jax.block_until_ready(actor_critic_forward(state2, params))
    ref2 = _reference_forward(state2, params)
    assert value2.shape == (37, 1)
    assert jnp.allclose(value2, ref2, atol=1e-5, rtol=1e-5), "mismatch vs reference (B=37)"

    print("KERNEL_OK")
</pallas_src>

<mosaic_0001>
module attributes {stable_mosaic.version = 11 : i64} {
  func.func @_critic_mlp_kernel(%arg0: i32, %arg1: memref<64x16xf32, #tpu.memory_space<vmem>>, %arg2: memref<16x256xf32, #tpu.memory_space<vmem>>, %arg3: memref<1x256xf32, #tpu.memory_space<vmem>>, %arg4: memref<256x128xf32, #tpu.memory_space<vmem>>, %arg5: memref<1x128xf32, #tpu.memory_space<vmem>>, %arg6: memref<1x128xf32, #tpu.memory_space<vmem>>, %arg7: memref<1xf32, #tpu.memory_space<smem>>, %arg8: memref<64x1xf32, #tpu.memory_space<vmem>>) attributes {dimension_semantics = [#tpu.dimension_semantics<parallel>], iteration_bounds = array<i64: 1>, scalar_prefetch = 0 : i64, scratch_operands = 0 : i64, tpu.core_type = #tpu.core_type<tc>, window_params = [{transform_indices = @transform_0, window_bounds = array<i64: 64, 16>}, {pipeline_mode = #tpu.pipeline_mode<synchronous>, transform_indices = @transform_1, window_bounds = array<i64: 16, 256>}, {pipeline_mode = #tpu.pipeline_mode<synchronous>, transform_indices = @transform_2, window_bounds = array<i64: 1, 256>}, {pipeline_mode = #tpu.pipeline_mode<synchronous>, transform_indices = @transform_3, window_bounds = array<i64: 256, 128>}, {pipeline_mode = #tpu.pipeline_mode<synchronous>, transform_indices = @transform_4, window_bounds = array<i64: 1, 128>}, {pipeline_mode = #tpu.pipeline_mode<synchronous>, transform_indices = @transform_5, window_bounds = array<i64: 1, 128>}, {transform_indices = @transform_6, window_bounds = array<i64: 1>}, {transform_indices = @transform_7, window_bounds = array<i64: 64, 1>}]} {
    %c0 = arith.constant 0 : index
    %c0_0 = arith.constant 0 : index
    %0 = vector.load %arg1[%c0, %c0_0] : memref<64x16xf32, #tpu.memory_space<vmem>>, vector<64x16xf32>
    %c0_1 = arith.constant 0 : index
    %c0_2 = arith.constant 0 : index
    %1 = vector.load %arg2[%c0_1, %c0_2] : memref<16x256xf32, #tpu.memory_space<vmem>>, vector<16x256xf32>
    %cst = arith.constant dense<0.000000e+00> : vector<64x256xf32>
    %2 = tpu.matmul %0, %1, %cst {dimension_numbers = #tpu.dot_dimension_numbers<[1], [0], [0], [1], [0, 0, 1, 1], [], []>} : vector<64x16xf32>, vector<16x256xf32>, vector<64x256xf32> -> vector<64x256xf32>
    %c0_3 = arith.constant 0 : index
    %c0_4 = arith.constant 0 : index
    %3 = vector.load %arg3[%c0_3, %c0_4] : memref<1x256xf32, #tpu.memory_space<vmem>>, vector<1x256xf32>
    %4 = vector.broadcast %3 : vector<1x256xf32> to vector<64x256xf32>
    %5 = arith.addf %2, %4 : vector<64x256xf32>
    %cst_5 = arith.constant 0.000000e+00 : f32
    %6 = vector.broadcast %cst_5 : f32 to vector<64x256xf32>
    %7 = arith.maximumf %5, %6 : vector<64x256xf32>
    %c0_6 = arith.constant 0 : index
    %c0_7 = arith.constant 0 : index
    %8 = vector.load %arg4[%c0_6, %c0_7] : memref<256x128xf32, #tpu.memory_space<vmem>>, vector<256x128xf32>
    %cst_8 = arith.constant dense<0.000000e+00> : vector<64x128xf32>
    %9 = tpu.matmul %7, %8, %cst_8 {dimension_numbers = #tpu.dot_dimension_numbers<[1], [0], [0], [1], [0, 0, 1, 1], [], []>} : vector<64x256xf32>, vector<256x128xf32>, vector<64x128xf32> -> vector<64x128xf32>
    %c0_9 = arith.constant 0 : index
    %c0_10 = arith.constant 0 : index
    %10 = vector.load %arg5[%c0_9, %c0_10] : memref<1x128xf32, #tpu.memory_space<vmem>>, vector<1x128xf32>
    %11 = vector.broadcast %10 : vector<1x128xf32> to vector<64x128xf32>
    %12 = arith.addf %9, %11 : vector<64x128xf32>
    %cst_11 = arith.constant 0.000000e+00 : f32
    %13 = vector.broadcast %cst_11 : f32 to vector<64x128xf32>
    %14 = arith.maximumf %12, %13 : vector<64x128xf32>
    %c0_12 = arith.constant 0 : index
    %c0_13 = arith.constant 0 : index
    %15 = vector.load %arg6[%c0_12, %c0_13] : memref<1x128xf32, #tpu.memory_space<vmem>>, vector<1x128xf32>
    %16 = vector.broadcast %15 : vector<1x128xf32> to vector<64x128xf32>
    %17 = arith.mulf %14, %16 : vector<64x128xf32>
    %cst_14 = arith.constant dense<0.000000e+00> : vector<64xf32>
    %18 = vector.multi_reduction <add>, %17, %cst_14 [1] : vector<64x128xf32> to vector<64xf32>
    %19 = vector.shape_cast %18 : vector<64xf32> to vector<64x1xf32>
    %c0_15 = arith.constant 0 : index
    %20 = memref.load %arg7[%c0_15] : memref<1xf32, #tpu.memory_space<smem>>
    %21 = vector.broadcast %20 : f32 to vector<64x1xf32>
    %22 = arith.addf %19, %21 : vector<64x1xf32>
    %c0_16 = arith.constant 0 : index
    %c0_17 = arith.constant 0 : index
    %23 = vector.load %arg8[%c0_16, %c0_17] : memref<64x1xf32, #tpu.memory_space<vmem>>, vector<64x1xf32>
    tpu.vector_store %arg8[%c0_16, %c0_17], %22 {strides = array<i32>} : memref<64x1xf32, #tpu.memory_space<vmem>>, vector<64x1xf32>,
    return
  }
  func.func @transform_0(%arg0: i32) -> (i32, i32) {
    %c0_i32 = arith.constant 0 : i32
    %c0_i32_0 = arith.constant 0 : i32
    return %arg0, %c0_i32 : i32, i32
  }
  func.func @transform_1(%arg0: i32) -> (i32, i32) {
    %c0_i32 = arith.constant 0 : i32
    %c0_i32_0 = arith.constant 0 : i32
    %c0_i32_1 = arith.constant 0 : i32
    return %c0_i32, %c0_i32_0 : i32, i32
  }
  func.func @transform_2(%arg0: i32) -> (i32, i32) {
    %c0_i32 = arith.constant 0 : i32
    %c0_i32_0 = arith.constant 0 : i32
    %c0_i32_1 = arith.constant 0 : i32
    return %c0_i32, %c0_i32_0 : i32, i32
  }
  func.func @transform_3(%arg0: i32) -> (i32, i32) {
    %c0_i32 = arith.constant 0 : i32
    %c0_i32_0 = arith.constant 0 : i32
    %c0_i32_1 = arith.constant 0 : i32
    return %c0_i32, %c0_i32_0 : i32, i32
  }
  func.func @transform_4(%arg0: i32) -> (i32, i32) {
    %c0_i32 = arith.constant 0 : i32
    %c0_i32_0 = arith.constant 0 : i32
    %c0_i32_1 = arith.constant 0 : i32
    return %c0_i32, %c0_i32_0 : i32, i32
  }
  func.func @transform_5(%arg0: i32) -> (i32, i32) {
    %c0_i32 = arith.constant 0 : i32
    %c0_i32_0 = arith.constant 0 : i32
    %c0_i32_1 = arith.constant 0 : i32
    return %c0_i32, %c0_i32_0 : i32, i32
  }
  func.func @transform_6(%arg0: i32) -> i32 {
    %c0_i32 = arith.constant 0 : i32
    %c0_i32_0 = arith.constant 0 : i32
    return %c0_i32 : i32
  }
  func.func @transform_7(%arg0: i32) -> (i32, i32) {
    %c0_i32 = arith.constant 0 : i32
    %c0_i32_0 = arith.constant 0 : i32
    return %arg0, %c0_i32 : i32, i32
  }
}

</mosaic_0001>

<bundles_post_ra>
// kernel: actor_critic_forward.1
= control target key start
LH: loop header
LB: loop body
LE: loop exit
PB: predicated region body
PF: predicated region fallthrough
CT: control target
= control target key end

     0   :  { %13 = vsyncpa [#allocation4], 0  ;;  %s572_s24 = smov [#allocation3]   ;;  %s724_s0 = inlined_call_operand.vmem [shape: f32[64,16], index: 0, kind: input, shape index: {}]   ;;  %s725_s1 = inlined_call_operand.vmem [shape: f32[16,256], index: 1, kind: input, shape index: {}]   ;;  %s726_s2 = inlined_call_operand.vmem [shape: f32[1,256], index: 2, kind: input, shape index: {}]   ;;  %s727_s3 = inlined_call_operand.hbm [shape: f32[256,128], index: 3, kind: input, shape index: {}]   ;;  %s728_s4 = inlined_call_operand.vmem [shape: f32[1,128], index: 4, kind: input, shape index: {}]   ;;  %s729_s5 = inlined_call_operand.vmem [shape: f32[1,128], index: 5, kind: input, shape index: {}]   ;;  %s730_s6 = inlined_call_operand.<no memory space> [shape: f32[1], index: 6, kind: input, shape index: {}]   ;;  %s731_s7 = inlined_call_operand.vmem [shape: f32[64,1], index: 7, kind: output, shape index: {}]  }
   0x1   :  { %s25_s25 = sshll.u32 %s572_s24, 4  ;;  %s548_s28 = scalar_lea.hbm %s727_s3, 4096  ;;  %s26_s25 = int_to_ptr.vmem [resolvable:$true] %s25_s25 }
   0x2   :  { %p549_p0 = scmp.ne.s32.totalorder %s727_s3, %s548_s28  ;;  %p552_p1 = scmp.lt.u32.totalorder %s548_s28, %s727_s3 }
   0x4   :  { %p554_p2 = pnand %p552_p1, %p549_p0 }
   0x6   :  { %557 = shalt.err (!%p554_p2)
}
   0x7   :  { %s558_s10 = scalar_lea.vmem %s26_s25, 4096  ;;  %p563_p4 = scmp.lt.s32.totalorder %s26_s25, %s26_s25 }
   0x8   :  { %p559_p3 = scmp.ne.s32.totalorder %s26_s25, %s558_s10  ;;  %p564_p5 = scmp.lt.s32.totalorder %s558_s10, %s558_s10 }
   0xa   :  { %p565_p6 = por %p564_p5, %p563_p4 }
   0xc   :  { %p566_p7 = pnand %p565_p6, %p559_p3 }
   0xe   :  { %569 = shalt.err (!%p566_p7)
}
   0xf   :  { %s573_s11 = smov 128   ;;  %s574_s12 = smov 8  }
  0x10   :  { %31 = dma.hbm_to_vmem [thread:$0]  %s727_s3, 4096, %s26_s25, [#allocation4], %s573_s11, %s573_s11, %s574_s12  }
  0x11   :  { %570 = dma.done.wait [#allocation4], 4096  }
  0x12   :  { %571 = vsyncadd [#allocation4], 4294963200  ;;  %v575_v0 = vmov 0.0   ;;  %v50_v1 = vld [vmem:[%s725_s1 + $0x8] sm:$0xff]  ;;  %v52_v2 = vld [vmem:[%s725_s1 + $0x18] sm:$0xff]  ;;  %vm65_vm0 = vcmask 130048   ;;  %v55_v63 = vlaneseq }
  0x13   :  { %154 = vmatprep.mubr.f32.mxu0 %v575_v0  ;;  %v49_v3 = vld [vmem:[%s725_s1] sm:$0xff]  ;;  %v492_v4 = vpack.c.bf16 %v52_v2, %v50_v1  ;;  %v51_v5 = vld [vmem:[%s725_s1 + $0x10] sm:$0xff]  ;;  %v236_v9 = vld [vmem:[#allocation3 + $0x88] sm:$0xff]  ;;  %vm412_vm1 = vcmask 7168  }
  0x14   :  { %v494_v6 = vpack.c.bf16 %v51_v5, %v49_v3  ;;  %v41_v7 = vld [vmem:[%s724_s0] sm:$0xff]  ;;  %v220_v12 = vld [vmem:[#allocation3 + $0x8] sm:$0xff]  ;;  %v237_v13 = vld [vmem:[#allocation3 + $0x90] sm:$0xff] }
  0x15   :  { %493 = vmatprep.subr.bf16.mxu0 %v492_v4  ;;  %v235_v8 = vld [vmem:[#allocation3 + $0x80] sm:$0xff]  ;;  %v238_v14 = vld [vmem:[#allocation3 + $0x98] sm:$0xff]  ;;  %v221_v17 = vld [vmem:[#allocation3 + $0x10] sm:$0xff] }
  0x16   :  { %495 = vmatpush1.bf16.msra.mxu0 %v494_v6  ;;  %v219_v10 = vld [vmem:[#allocation3] sm:$0xff]  ;;  %v496_v11 = vpack.c.bf16 %v236_v9, %v235_v8  ;;  %v500_v16 = vpack.c.bf16 %v238_v14, %v237_v13  ;;  %v222_v18 = vld [vmem:[#allocation3 + $0x18] sm:$0xff]  ;;  %v240_v20 = vld [vmem:[#allocation3 + $0xa8] sm:$0xff] }
  0x17   :  { %v498_v15 = vpack.c.bf16 %v220_v12, %v219_v10  ;;  %v239_v19 = vld [vmem:[#allocation3 + $0xa0] sm:$0xff]  ;;  %v42_v21 = vld [vmem:[%s724_s0 + $0x8] sm:$0xff]  ;;  %v502_v22 = vpack.c.bf16 %v222_v18, %v221_v17  ;;  %v241_v26 = vld [vmem:[#allocation3 + $0xb0] sm:$0xff] }
  0x18   :  { %497 = vmatprep.subr.bf16.mxu0 %v496_v11  ;;  %v504_v23 = vpack.c.bf16 %v240_v20, %v239_v19  ;;  %v223_v24 = vld [vmem:[#allocation3 + $0x20] sm:$0xff]  ;;  %v224_v25 = vld [vmem:[#allocation3 + $0x28] sm:$0xff]  ;;  %528 = vmatprep.subr.bf16.mxu1 %v496_v11  ;;  %v242_v27 = vld [vmem:[#allocation3 + $0xb8] sm:$0xff] }
  0x19   :  { %426 = vmatmul.mubr.msk.f32.vlgmr.msra.gmra.mrb[0].mxu0 %vm65_vm0, %v41_v7  ;;  %536 = vmatpush3.bf16.msra.mxu1 %v498_v15  ;;  %v43_v28 = vld [vmem:[%s724_s0 + $0x10] sm:$0xff]  ;;  %v506_v29 = vpack.c.bf16 %v224_v25, %v223_v24  ;;  %v508_v30 = vpack.c.bf16 %v242_v27, %v241_v26  ;;  %v226_v32 = vld [vmem:[#allocation3 + $0x38] sm:$0xff]  ;;  %v243_v33 = vld [vmem:[#allocation3 + $0xc0] sm:$0xff] }
  0x1a   :  { %160 = vmatprep.mubr.f32.mxu0 %v575_v0  ;;  %499 = vmatpush3.bf16.msra.mxu0 %v498_v15  ;;  %v225_v31 = vld [vmem:[#allocation3 + $0x30] sm:$0xff]  ;;  %v244_v34 = vld [vmem:[#allocation3 + $0xc8] sm:$0xff]  ;;  %v44_v35 = vld [vmem:[%s724_s0 + $0x18] sm:$0xff] }
  0x1b   :  { %501 = vmatprep.subr.bf16.mxu0 %v500_v16  ;;  %529 = vmatprep.subr.bf16.mxu1 %v500_v16  ;;  %v510_v36 = vpack.c.bf16 %v226_v32, %v225_v31  ;;  %v512_v37 = vpack.c.bf16 %v244_v34, %v243_v33  ;;  %v227_v38 = vld [vmem:[#allocation3 + $0x40] sm:$0xff]  ;;  %v228_v39 = vld [vmem:[#allocation3 + $0x48] sm:$0xff]  ;;  %v245_v40 = vld [vmem:[#allocation3 + $0xd0] sm:$0xff] }
  0x1c   :  { %v246_v41 = vld [vmem:[#allocation3 + $0xd8] sm:$0xff]  ;;  %v45_v42 = vld [vmem:[%s724_s0 + $0x20] sm:$0xff]  ;;  %v514_v43 = vpack.c.bf16 %v228_v39, %v227_v38  ;;  %v229_v45 = vld [vmem:[#allocation3 + $0x50] sm:$0xff] }
  0x1d   :  { %427 = vmatmul.mubr.msk.f32.gmra.mrb[2].mxu0 %vm65_vm0, %v42_v21  ;;  %537 = vmatpush3.bf16.msra.mxu1 %v502_v22  ;;  %v516_v44 = vpack.c.bf16 %v246_v41, %v245_v40  ;;  %v230_v46 = vld [vmem:[#allocation3 + $0x58] sm:$0xff]  ;;  %v247_v47 = vld [vmem:[#allocation3 + $0xe0] sm:$0xff]  ;;  %v248_v48 = vld [vmem:[#allocation3 + $0xe8] sm:$0xff] }
  0x1e   :  { %166 = vmatprep.mubr.f32.mxu0 %v575_v0  ;;  %503 = vmatpush3.bf16.msra.mxu0 %v502_v22  ;;  %v46_v49 = vld [vmem:[%s724_s0 + $0x28] sm:$0xff]  ;;  %v518_v50 = vpack.c.bf16 %v230_v46, %v229_v45  ;;  %v520_v51 = vpack.c.bf16 %v248_v48, %v247_v47  ;;  %v47_v52 = vld [vmem:[%s724_s0 + $0x30] sm:$0xff]  ;;  %v48_v53 = vld [vmem:[%s724_s0 + $0x38] sm:$0xff] }
  0x1f   :  { %505 = vmatprep.subr.bf16.mxu0 %v504_v23  ;;  %530 = vmatprep.subr.bf16.mxu1 %v504_v23  ;;  %v231_v54 = vld [vmem:[#allocation3 + $0x60] sm:$0xff]  ;;  %v232_v55 = vld [vmem:[#allocation3 + $0x68] sm:$0xff]  ;;  %v249_v57 = vld [vmem:[#allocation3 + $0xf0] sm:$0xff] }
  0x20   :  { %v522_v56 = vpack.c.bf16 %v232_v55, %v231_v54  ;;  %v250_v58 = vld [vmem:[#allocation3 + $0xf8] sm:$0xff]  ;;  %v233_v60 = vld [vmem:[#allocation3 + $0x70] sm:$0xff]  ;;  %v53_v2 = vld [vmem:[%s726_s2] sm:$0x3] }
  0x21   :  { %428 = vmatmul.mubr.msk.f32.gmra.mrb[4].mxu0 %vm65_vm0, %v43_v28  ;;  %538 = vmatpush3.bf16.msra.mxu1 %v506_v29  ;;  %v524_v59 = vpack.c.bf16 %v250_v58, %v249_v57  ;;  %v234_v61 = vld [vmem:[#allocation3 + $0x78] sm:$0xff] }
  0x22   :  { %172 = vmatprep.mubr.f32.mxu0 %v575_v0  ;;  %507 = vmatpush3.bf16.msra.mxu0 %v506_v29  ;;  %v526_v62 = vpack.c.bf16 %v234_v61, %v233_v60  ;;  %v435_v61 = vld [vmem:[%s729_s5] ss:$0 sm:$0xff] }
  0x23   :  { %509 = vmatprep.subr.bf16.mxu0 %v508_v30  ;;  %531 = vmatprep.subr.bf16.mxu1 %v508_v30 }
  0x25   :  { %429 = vmatmul.mubr.msk.f32.gmra.mrb[6].mxu0 %vm65_vm0, %v44_v35  ;;  %539 = vmatpush3.bf16.msra.mxu1 %v510_v36 }
  0x26   :  { %178 = vmatprep.mubr.f32.mxu0 %v575_v0  ;;  %511 = vmatpush3.bf16.msra.mxu0 %v510_v36 }
  0x27   :  { %513 = vmatprep.subr.bf16.mxu0 %v512_v37  ;;  %532 = vmatprep.subr.bf16.mxu1 %v512_v37 }
  0x29   :  { %430 = vmatmul.mubr.msk.f32.gmra.mrb[8].mxu0 %vm65_vm0, %v45_v42  ;;  %540 = vmatpush3.bf16.msra.mxu1 %v514_v43 }
  0x2a   :  { %184 = vmatprep.mubr.f32.mxu0 %v575_v0  ;;  %515 = vmatpush3.bf16.msra.mxu0 %v514_v43 }
  0x2b   :  { %517 = vmatprep.subr.bf16.mxu0 %v516_v44  ;;  %533 = vmatprep.subr.bf16.mxu1 %v516_v44 }
  0x2d   :  { %431 = vmatmul.mubr.msk.f32.gmra.mrb[10].mxu0 %vm65_vm0, %v46_v49  ;;  %541 = vmatpush3.bf16.msra.mxu1 %v518_v50 }
  0x2e   :  { %190 = vmatprep.mubr.f32.mxu0 %v575_v0  ;;  %519 = vmatpush3.bf16.msra.mxu0 %v518_v50 }
  0x2f   :  { %521 = vmatprep.subr.bf16.mxu0 %v520_v51  ;;  %534 = vmatprep.subr.bf16.mxu1 %v520_v51 }
  0x31   :  { %432 = vmatmul.mubr.msk.f32.gmra.mrb[12].mxu0 %vm65_vm0, %v47_v52  ;;  %542 = vmatpush3.bf16.msra.mxu1 %v522_v56 }
  0x32   :  { %196 = vmatprep.mubr.f32.mxu0 %v575_v0  ;;  %523 = vmatpush3.bf16.msra.mxu0 %v522_v56  ;;  %v56_v0 = vshrl.u32 %v55_v63, 7  ;;  %v434_v56 = vld [vmem:[%s728_s4] ss:$0 sm:$0xff] }
  0x33   :  { %525 = vmatprep.subr.bf16.mxu0 %v524_v59  ;;  %535 = vmatprep.subr.bf16.mxu1 %v524_v59 }
  0x34   :  { %v57_v1 = vsub.s32 0, %v56_v0  ;;  %v61_v3 = vsub.s32 1, %v56_v0 }
  0x35   :  { %433 = vmatmul.mubr.msk.f32.gmra.mrb[14].mxu0 %vm65_vm0, %v48_v53  ;;  %543 = vmatpush3.bf16.msra.mxu1 %v526_v62 }
  0x36   :  { %527 = vmatpush3.bf16.msra.mxu0 %v526_v62  ;;  %v58_v4 = vrot.slane %v53_v2, %v57_v1  ;;  %v62_v5 = vrot.slane %v53_v2, %v61_v3 }
  0xec   :  { %v156_v6 = vpop.f32.mrb[0].mxu0 }
  0xed   :  { %v157_v7 = vadd.f32 %v156_v6, %v58_v4  ;;  %v158_v8 = vpop.f32.mrb[1].mxu0 }
  0xee   :  { %v159_v9 = vadd.f32 %v158_v8, %v62_v5 }
  0xef   :  { %v203_v12 = vmax.f32 %v157_v7, 0.0 }
  0xf0   :  { %v204_v10 = vmax.f32 %v159_v9, 0.0  ;;  %v162_v11 = vpop.f32.mrb[2].mxu0 }
  0xf1   :  { %v163_v13 = vadd.f32 %v162_v11, %v58_v4  ;;  %v164_v14 = vpop.f32.mrb[3].mxu0 }
  0xf2   :  { %v165_v15 = vadd.f32 %v164_v14, %v62_v5  ;;  %322 = vmatprep.mubr.f32.mxu0 %v204_v10 }
  0xf3   :  { %323 = vmatmul.mubr.f32.vlgmr.msra.gmra.mrb[16].mxu0 %v203_v12  ;;  %v205_v18 = vmax.f32 %v163_v13, 0.0 }
  0xf4   :  { %v206_v16 = vmax.f32 %v165_v15, 0.0  ;;  %v168_v17 = vpop.f32.mrb[4].mxu0 }
  0xf5   :  { %v169_v19 = vadd.f32 %v168_v17, %v58_v4  ;;  %v170_v20 = vpop.f32.mrb[5].mxu0 }
  0xf6   :  { %v171_v21 = vadd.f32 %v170_v20, %v62_v5  ;;  %327 = vmatprep.mubr.f32.mxu0 %v206_v16 }
  0xf7   :  { %328 = vmatmul.mubr.f32.gmra.mrb[18].mxu0 %v205_v18  ;;  %v207_v24 = vmax.f32 %v169_v19, 0.0 }
  0xf8   :  { %v208_v22 = vmax.f32 %v171_v21, 0.0  ;;  %v174_v23 = vpop.f32.mrb[6].mxu0 }
  0xf9   :  { %v175_v25 = vadd.f32 %v174_v23, %v58_v4  ;;  %v176_v26 = vpop.f32.mrb[7].mxu0 }
  0xfa   :  { %332 = vmatprep.mubr.f32.mxu0 %v208_v22  ;;  %v177_v27 = vadd.f32 %v176_v26, %v62_v5 }
  0xfb   :  { %333 = vmatmul.mubr.f32.gmra.mrb[20].mxu0 %v207_v24  ;;  %v209_v30 = vmax.f32 %v175_v25, 0.0 }
  0xfc   :  { %v180_v28 = vpop.f32.mrb[8].mxu0  ;;  %v210_v29 = vmax.f32 %v177_v27, 0.0 }
  0xfd   :  { %v181_v31 = vadd.f32 %v180_v28, %v58_v4  ;;  %v182_v32 = vpop.f32.mrb[9].mxu0 }
  0xfe   :  { %v183_v33 = vadd.f32 %v182_v32, %v62_v5  ;;  %337 = vmatprep.mubr.f32.mxu1 %v210_v29 }
  0xff   :  { %338 = vmatmul.mubr.f32.vlgmr.msra.gmra.mrb[0].mxu1 %v209_v30  ;;  %v211_v36 = vmax.f32 %v181_v31, 0.0 }
 0x100   :  { %v212_v34 = vmax.f32 %v183_v33, 0.0  ;;  %v186_v35 = vpop.f32.mrb[10].mxu0 }
 0x101   :  { %v187_v37 = vadd.f32 %v186_v35, %v58_v4  ;;  %v188_v38 = vpop.f32.mrb[11].mxu0 }
 0x102   :  { %v189_v39 = vadd.f32 %v188_v38, %v62_v5  ;;  %342 = vmatprep.mubr.f32.mxu1 %v212_v34 }
 0x103   :  { %343 = vmatmul.mubr.f32.gmra.mrb[2].mxu1 %v211_v36  ;;  %v213_v42 = vmax.f32 %v187_v37, 0.0 }
 0x104   :  { %v214_v40 = vmax.f32 %v189_v39, 0.0  ;;  %v192_v41 = vpop.f32.mrb[12].mxu0 }
 0x105   :  { %v193_v43 = vadd.f32 %v192_v41, %v58_v4  ;;  %v194_v44 = vpop.f32.mrb[13].mxu0 }
 0x106   :  { %v195_v45 = vadd.f32 %v194_v44, %v62_v5  ;;  %347 = vmatprep.mubr.f32.mxu1 %v214_v40  ;;  %v403_v40 = vstv %s730_s6 }
 0x107   :  { %348 = vmatmul.mubr.f32.gmra.mrb[4].mxu1 %v213_v42  ;;  %v215_v48 = vmax.f32 %v193_v43, 0.0 }
 0x108   :  { %v216_v46 = vmax.f32 %v195_v45, 0.0  ;;  %v198_v47 = vpop.f32.mrb[14].mxu0 }
 0x109   :  { %v199_v49 = vadd.f32 %v198_v47, %v58_v4  ;;  %v200_v50 = vpop.f32.mrb[15].mxu0 }
 0x10a   :  { %v201_v51 = vadd.f32 %v200_v50, %v62_v5  ;;  %352 = vmatprep.mubr.f32.mxu1 %v216_v46 }
 0x10b   :  { %353 = vmatmul.mubr.f32.gmra.mrb[6].mxu1 %v215_v48  ;;  %v217_v53 = vmax.f32 %v199_v49, 0.0 }
 0x10c   :  { %v218_v52 = vmax.f32 %v201_v51, 0.0 }
 0x10e   :  { %357 = vmatprep.mubr.f32.mxu1 %v218_v52 }
 0x10f   :  { %358 = vmatmul.mubr.f32.gmra.mrb[8].mxu1 %v217_v53 }
 0x1c6   :  { %v468_v54 = vpop.f32.mrb[16].mxu0 }
 0x1c7   :  { %v469_v55 = vpop.f32.mrb[17].mxu0 }
 0x1c8   :  { %v470_v57 = vadd.f32 %v469_v55, %v468_v54 }
 0x1ca   :  { %v471_v58 = vpop.f32.mrb[18].mxu0  ;;  %v325_v59 = vadd.f32 %v470_v57, %v434_v56 }
 0x1cb   :  { %v472_v60 = vpop.f32.mrb[19].mxu0 }
 0x1cc   :  { %v473_v62 = vadd.f32 %v472_v60, %v471_v58  ;;  %v363_v63 = vmax.f32 %v325_v59, 0.0 }
 0x1ce   :  { %v330_v0 = vadd.f32 %v473_v62, %v434_v56  ;;  %v474_v1 = vpop.f32.mrb[20].mxu0  ;;  %v378_v2 = vmul.f32 %v435_v61, %v363_v63 }
 0x1cf   :  { %v475_v3 = vpop.f32.mrb[21].mxu0 }
 0x1d0   :  { %v364_v4 = vmax.f32 %v330_v0, 0.0  ;;  %v476_v5 = vadd.f32 %v475_v3, %v474_v1  ;;  %386 = vadd.xlane.f32.xlu0 %v378_v2 }
 0x1d2   :  { %v477_v6 = vpop.f32.mrb[0].mxu1  ;;  %v379_v7 = vmul.f32 %v435_v61, %v364_v4  ;;  %v335_v8 = vadd.f32 %v476_v5, %v434_v56 }
 0x1d3   :  { %v478_v9 = vpop.f32.mrb[1].mxu1 }
 0x1d4   :  { %v479_v10 = vadd.f32 %v478_v9, %v477_v6  ;;  %388 = vadd.xlane.f32.xlu0 %v379_v7  ;;  %v365_v11 = vmax.f32 %v335_v8, 0.0 }
 0x1d6   :  { %v340_v12 = vadd.f32 %v479_v10, %v434_v56  ;;  %v480_v13 = vpop.f32.mrb[2].mxu1  ;;  %v380_v14 = vmul.f32 %v435_v61, %v365_v11 }
 0x1d7   :  { %v481_v15 = vpop.f32.mrb[3].mxu1 }
 0x1d8   :  { %v366_v16 = vmax.f32 %v340_v12, 0.0  ;;  %v482_v17 = vadd.f32 %v481_v15, %v480_v13  ;;  %390 = vadd.xlane.f32.xlu1 %v380_v14 }
 0x1da   :  { %v345_v18 = vadd.f32 %v482_v17, %v434_v56  ;;  %v483_v19 = vpop.f32.mrb[4].mxu1  ;;  %v381_v20 = vmul.f32 %v435_v61, %v366_v16 }
 0x1db   :  { %v484_v21 = vpop.f32.mrb[5].mxu1 }
 0x1dc   :  { %v367_v22 = vmax.f32 %v345_v18, 0.0  ;;  %v485_v23 = vadd.f32 %v484_v21, %v483_v19  ;;  %392 = vadd.xlane.f32.xlu1 %v381_v20 }
 0x1de   :  { %v350_v24 = vadd.f32 %v485_v23, %v434_v56  ;;  %v486_v25 = vpop.f32.mrb[6].mxu1  ;;  %v382_v26 = vmul.f32 %v435_v61, %v367_v22 }
 0x1df   :  { %v487_v27 = vpop.f32.mrb[7].mxu1 }
 0x1e0   :  { %v368_v28 = vmax.f32 %v350_v24, 0.0  ;;  %v488_v29 = vadd.f32 %v487_v27, %v486_v25  ;;  %394 = vadd.xlane.f32.xlu0 %v382_v26 }
 0x1e2   :  { %v355_v30 = vadd.f32 %v488_v29, %v434_v56  ;;  %v489_v31 = vpop.f32.mrb[8].mxu1  ;;  %v383_v32 = vmul.f32 %v435_v61, %v368_v28 }
 0x1e3   :  { %v490_v33 = vpop.f32.mrb[9].mxu1 }
 0x1e4   :  { %v369_v34 = vmax.f32 %v355_v30, 0.0  ;;  %v491_v35 = vadd.f32 %v490_v33, %v489_v31  ;;  %396 = vadd.xlane.f32.xlu1 %v383_v32 }
 0x1e6   :  { %v360_v36 = vadd.f32 %v491_v35, %v434_v56  ;;  %v384_v37 = vmul.f32 %v435_v61, %v369_v34 }
 0x1e8   :  { %v370_v38 = vmax.f32 %v360_v36, 0.0  ;;  %398 = vadd.xlane.f32.xlu0 %v384_v37 }
 0x1ea   :  { %v385_v39 = vmul.f32 %v435_v61, %v370_v38 }
 0x1ec   :  { %400 = vadd.xlane.f32.xlu1 %v385_v39 }
 0x25d   :  { %v387_v41 = vpop.xlane.xlu0 %386 }
 0x25e   :  { %v404_v42 = vadd.f32 %v403_v40, %v387_v41 }
 0x260   :  { %413 = vst.msk [vmem:[%s731_s7] sm:$0xff] %vm412_vm1, %v404_v42 }
 0x261   :  { %v389_v43 = vpop.xlane.xlu0 %388 }
 0x262   :  { %v405_v44 = vadd.f32 %v403_v40, %v389_v43 }
 0x264   :  { %414 = vst.msk [vmem:[%s731_s7 + $0x8] sm:$0xff] %vm412_vm1, %v405_v44 }
 0x265   :  { %v391_v45 = vpop.xlane.xlu1 %390 }
 0x266   :  { %v406_v46 = vadd.f32 %v403_v40, %v391_v45 }
 0x268   :  { %415 = vst.msk [vmem:[%s731_s7 + $0x10] sm:$0xff] %vm412_vm1, %v406_v46 }
 0x269   :  { %v393_v47 = vpop.xlane.xlu1 %392 }
 0x26a   :  { %v407_v48 = vadd.f32 %v403_v40, %v393_v47 }
 0x26c   :  { %416 = vst.msk [vmem:[%s731_s7 + $0x18] sm:$0xff] %vm412_vm1, %v407_v48 }
 0x26d   :  { %v395_v49 = vpop.xlane.xlu0 %394 }
 0x26e   :  { %v408_v50 = vadd.f32 %v403_v40, %v395_v49 }
 0x270   :  { %417 = vst.msk [vmem:[%s731_s7 + $0x20] sm:$0xff] %vm412_vm1, %v408_v50 }
 0x271   :  { %v397_v51 = vpop.xlane.xlu1 %396 }
 0x272   :  { %v409_v52 = vadd.f32 %v403_v40, %v397_v51 }
 0x274   :  { %418 = vst.msk [vmem:[%s731_s7 + $0x28] sm:$0xff] %vm412_vm1, %v409_v52 }
 0x275   :  { %v399_v53 = vpop.xlane.xlu0 %398 }
 0x276   :  { %v410_v54 = vadd.f32 %v403_v40, %v399_v53 }
 0x278   :  { %419 = vst.msk [vmem:[%s731_s7 + $0x30] sm:$0xff] %vm412_vm1, %v410_v54 }
 0x279   :  { %v401_v55 = vpop.xlane.xlu1 %400 }
 0x27a   :  { %v411_v56 = vadd.f32 %v403_v40, %v401_v55 }
 0x27c   :  { %420 = vst.msk [vmem:[%s731_s7 + $0x38] sm:$0xff] %vm412_vm1, %v411_v56 }
 0x27d   :  { %425 = vsyncpa [#allocation4], 1 }

</bundles_post_ra>
